<compile_context>
chip_gen: v7x
topology: tpu7x:2x2x1
jax: 0.10.0
libtpu: 0.0.40
codegen_flags: <defaults>
</compile_context>

<pallas_src>
import functools

import jax
import jax.numpy as jnp
from jax import lax
from jax.experimental import pallas as pl
from jax.experimental.pallas import tpu as pltpu


# ----------------------------------------------------------------------------
# Pallas kernel: one lane-tile of positions per grid step.
# Orientation: K (classes) on sublanes, positions on lanes, C contracted.
# ----------------------------------------------------------------------------
def _entropy_kernel(feats_ref, protos_ref, proto_sq_ref, cls_ref, out_ref, *,
                    inv_scale):
    feats = feats_ref[...]          # (C, tile)  bf16/f32  native-layout features
    protos = protos_ref[...]        # (K, C)     bf16/f32  prototypes (resident)
    proto_sq = proto_sq_ref[...]    # (K, 1)     f32       hoisted |p|^2
    cls = cls_ref[...]              # (1, tile)  int32     predicted class ids

    # dist_t[k, n] = |p_k|^2 - 2 * p_k . x_n .  The per-column |x_n|^2 term and
    # the torch.clamp(min=1e-12) are dropped: the rank comparison below is
    # invariant to adding a per-column constant (they only matter for exact
    # ties / clamp-active degenerate cases).
    # Contraction: protos dim 1 with feats dim 0 -> MXU-native, no transposes.
    dist_t = proto_sq - 2.0 * lax.dot_general(
        protos, feats,
        dimension_numbers=(((1,), (0,)), ((), ())),
        preferred_element_type=jnp.float32)                    # (K, tile) f32

    # In-kernel one-hot selection of each column's predicted-class distance.
    sel = lax.broadcasted_iota(jnp.int32, dist_t.shape, 0) == cls       # (K, tile)
    class_dist = jnp.sum(jnp.where(sel, dist_t, 0.0), axis=0, keepdims=True)

    # Rank of the predicted class = number of prototypes strictly closer
    # (identical to torch.sort + argmax-of-match for distinct distances).
    rank = jnp.sum((dist_t < class_dist).astype(jnp.float32), axis=0,
                   keepdims=True)                                        # (1, tile)

    out_ref[...] = rank * inv_scale                            # lane-dense store


def _pick_tile(n, max_tile=2048):
    """Largest multiple-of-128 lane tile dividing n (<= max_tile).

    Prefers an EVEN number of grid steps (v7x shards the parallel axis across
    its 2 TensorCores), then >= 2 steps, then a single full-extent block.
    """
    divisors = [t for t in range(128, min(n, max_tile) + 1, 128) if n % t == 0]
    if not divisors:
        return n                      # full-extent block (small / odd n)
    even = [t for t in divisors if (n // t) % 2 == 0]
    if even:
        return max(even)
    multi = [t for t in divisors if n // t >= 2]
    return max(multi) if multi else max(divisors)


def _entropy_scores_pallas(feats_cn, protos, class_ids_row, *, num_classes,
                           max_tile=2048):
    """feats_cn: (C, N), protos: (K, C), class_ids_row: (1, N) -> (N,) scores."""
    c, n = feats_cn.shape
    k = protos.shape[0]
    assert num_classes > 1, "score scale divides by (num_classes - 1)"
    assert k == num_classes, "prototype rows must match num_classes"

    tile = _pick_tile(n, max_tile)
    n_iter = n // tile

    # Hoisted |p|^2 (computed from the same dtype the kernel's matmul consumes).
    proto_sq = jnp.sum(protos.astype(jnp.float32) ** 2, axis=-1, keepdims=True)

    cost = pl.CostEstimate(
        flops=2 * k * c * n,
        transcendentals=0,
        bytes_accessed=(n * c * feats_cn.dtype.itemsize          # feature stream
                        + k * c * protos.dtype.itemsize          # prototypes
                        + k * 4                                  # |p|^2
                        + n * 4                                  # class ids
                        + n * 4))                                # scores out

    kernel = functools.partial(_entropy_kernel,
                               inv_scale=1.0 / float(num_classes - 1))
    out = pl.pallas_call(
        kernel,
        out_shape=jax.ShapeDtypeStruct((1, n), jnp.float32),
        grid_spec=pltpu.PrefetchScalarGridSpec(
            num_scalar_prefetch=0,
            grid=(n_iter,),
            in_specs=[
                # Streamed feature tile; deeper buffering on long grids to
                # amortize per-step overhead (v7x: 3.2 TB/s drains tiles fast).
                pl.BlockSpec((c, tile), lambda i: (0, i),
                             pipeline_mode=pl.Buffered(min(3, max(2, n_iter)))),
                pl.BlockSpec((k, c), lambda i: (0, 0)),      # prototypes (resident)
                pl.BlockSpec((k, 1), lambda i: (0, 0)),      # |p|^2 (hoisted)
                pl.BlockSpec((1, tile), lambda i: (0, i)),   # class ids
            ],
            out_specs=pl.BlockSpec((1, tile), lambda i: (0, i)),
        ),
        compiler_params=pltpu.CompilerParams(
            dimension_semantics=("parallel",)),
        cost_estimate=cost,
    )(feats_cn, protos, proto_sq, class_ids_row)
    return out.reshape(n)


# ----------------------------------------------------------------------------
# Full forward (glue in plain JAX, hot path in the Pallas kernel above).
# ----------------------------------------------------------------------------
def feature_space_entropy_forward(features_tensor, outputs, sample_index,
                                  classes_prototypes, *, input_size, row_ratio,
                                  col_ratio, minibatch_size, num_classes):
    # disparity_mode == 'E' (Euclidean).  TODO(synk): 'C' cosine branch not wired up.
    b, c, h, w = features_tensor.shape
    assert b == 1 and c == 512, "reference torch code hard-codes view(1, h*w, 512)"
    assert outputs.shape[1] == num_classes == classes_prototypes.shape[1]
    full_row, full_col = input_size
    hw = h * w

    row = input_size[0] // row_ratio
    col = input_size[1] // col_ratio
    n_samples = row * col
    assert n_samples % minibatch_size == 0   # module consistency; kernel tiles itself

    # Native (C, H*W) layout: a pure reshape of NCHW -> no transpose and no
    # per-sample gather of the big feature map.  Ranks are computed densely
    # for every position (extra matmul FLOPs at small K are free in a
    # bandwidth-bound kernel) and only the tiny score vector is gathered.
    feats_cn = features_tensor.reshape(c, hw)
    if feats_cn.dtype == jnp.float32:
        # Halve the dominant HBM stream; ideally the feature extractor already
        # emits bf16 so this convert fuses away upstream.
        feats_cn = feats_cn.astype(jnp.bfloat16)

    # argmax is invariant under softmax -> softmax dropped (saves an exp pass).
    logits = jnp.squeeze(outputs, axis=0)                        # (K, h, w)
    class_ids_row = jnp.argmax(logits, axis=0).reshape(1, hw).astype(jnp.int32)

    protos = jnp.squeeze(classes_prototypes, axis=0).astype(feats_cn.dtype)  # (K, C)

    scores_all = _entropy_scores_pallas(
        feats_cn, protos, class_ids_row, num_classes=num_classes)   # (hw,)

    # Gather sampled scores, scatter into the full-resolution map
    # (matches torch.index_select + torch.scatter on dim=2).
    scores = jnp.take(scores_all, sample_index, axis=0)
    full = jnp.zeros((full_row * full_col,), jnp.float32)
    full = full.at[sample_index].set(scores)
    return full.reshape(full_row, full_col)


# ----------------------------------------------------------------------------
# Pure-JAX reference (mirrors the torch code: gather, full distance, sort,
# match, argmax), computed in f32.
# ----------------------------------------------------------------------------
def _reference(features_tensor, outputs, sample_index, classes_prototypes, *,
               input_size, num_classes):
    b, c, h, w = features_tensor.shape
    full_row, full_col = input_size
    feats_flat = jnp.transpose(features_tensor, (0, 2, 3, 1)).reshape(h * w, c)
    feats = jnp.take(feats_flat, sample_index, axis=0).astype(jnp.float32)
    logits = jnp.squeeze(outputs, axis=0)
    class_ids = jnp.argmax(jax.nn.softmax(logits, axis=0), axis=0).reshape(h * w)
    class_ids = jnp.take(class_ids, sample_index, axis=0)
    protos = jnp.squeeze(classes_prototypes, axis=0).astype(jnp.float32)

    dist = (-2.0 * feats @ protos.T
            + jnp.sum(feats ** 2, -1, keepdims=True)
            + jnp.sum(protos ** 2, -1)[None, :])
    dist = jnp.maximum(dist, 1e-12)
    order = jnp.argsort(dist, axis=1)                            # ascending
    match = (order == class_ids[:, None]).astype(jnp.int32)
    rank = jnp.argmax(match, axis=1).astype(jnp.float32)
    scores = rank / float(num_classes - 1)

    full = jnp.zeros((full_row * full_col,), jnp.float32)
    full = full.at[sample_index].set(scores)
    return full.reshape(full_row, full_col)


if __name__ == "__main__":
    # Small config consistent with the module:
    #   input_size=(32,32), row_ratio=col_ratio=2 -> 256 samples,
    #   minibatch_size=128 -> minibatch_iter=2, num_classes=8, c=512 (hard-coded).
    # Kernel lane tile = 512 positions -> grid of 2 parallel steps (even, so
    # both v7x TensorCores are busy).
    input_size = (32, 32)
    row_ratio = col_ratio = 2
    minibatch_size = 128
    num_classes = 8
    b, c, h, w = 1, 512, 32, 32

    key = jax.random.PRNGKey(0)
    k1, k2, k3, k4 = jax.random.split(key, 4)

    # Mixed-precision features / prototypes (the kernel's dominant HBM stream).
    features = jax.random.normal(k1, (b, c, h, w), jnp.float32).astype(jnp.bfloat16)
    outputs = jax.random.normal(k2, (1, num_classes, h, w), jnp.float32)
    classes_prototypes = jax.random.normal(
        k3, (1, num_classes, c), jnp.float32).astype(jnp.bfloat16)

    n_samples = (input_size[0] // row_ratio) * (input_size[1] // col_ratio)
    sample_index = jnp.sort(
        jax.random.permutation(k4, h * w)[:n_samples]).astype(jnp.int32)

    out = feature_space_entropy_forward(
        features, outputs, sample_index, classes_prototypes,
        input_size=input_size, row_ratio=row_ratio, col_ratio=col_ratio,
        minibatch_size=minibatch_size, num_classes=num_classes)
    out = jax.block_until_ready(out)

    ref = _reference(
        features, outputs, sample_index, classes_prototypes,
        input_size=input_size, num_classes=num_classes)

    assert out.shape == (input_size[0], input_size[1])
    # Rank scores are exact integers / (K-1); allow a tiny fraction of rank
    # flips from bf16 / accumulation-order near-ties instead of bitwise equality.
    mismatch_frac = float(jnp.mean((jnp.abs(out - ref) > 1e-6).astype(jnp.float32)))
    mae = float(jnp.mean(jnp.abs(out - ref)))
    assert mismatch_frac <= 0.01 and mae < 1e-3, (mismatch_frac, mae)
    print("KERNEL_OK")
</pallas_src>

<mosaic_0001>
module attributes {stable_mosaic.version = 11 : i64} {
  func.func @_entropy_kernel(%arg0: i32, %arg1: memref<512x512xbf16, #tpu.memory_space<vmem>>, %arg2: memref<8x512xbf16, #tpu.memory_space<vmem>>, %arg3: memref<8x1xf32, #tpu.memory_space<vmem>>, %arg4: memref<1x512xi32, #tpu.memory_space<vmem>>, %arg5: memref<1x512xf32, #tpu.memory_space<vmem>>) attributes {dimension_semantics = [#tpu.dimension_semantics<parallel>], iteration_bounds = array<i64: 2>, scalar_prefetch = 0 : i64, scratch_operands = 0 : i64, tpu.core_type = #tpu.core_type<tc>, window_params = [{pipeline_mode = #tpu.pipeline_mode<double_buffered>, transform_indices = @transform_0, window_bounds = array<i64: 512, 512>}, {pipeline_mode = #tpu.pipeline_mode<synchronous>, transform_indices = @transform_1, window_bounds = array<i64: 8, 512>}, {pipeline_mode = #tpu.pipeline_mode<synchronous>, transform_indices = @transform_2, window_bounds = array<i64: 8, 1>}, {transform_indices = @transform_3, window_bounds = array<i64: 1, 512>}, {transform_indices = @transform_4, window_bounds = array<i64: 1, 512>}]} {
    %c0 = arith.constant 0 : index
    %c0_0 = arith.constant 0 : index
    %0 = vector.load %arg1[%c0, %c0_0] : memref<512x512xbf16, #tpu.memory_space<vmem>>, vector<512x512xbf16>
    %c0_1 = arith.constant 0 : index
    %c0_2 = arith.constant 0 : index
    %1 = vector.load %arg2[%c0_1, %c0_2] : memref<8x512xbf16, #tpu.memory_space<vmem>>, vector<8x512xbf16>
    %c0_3 = arith.constant 0 : index
    %c0_4 = arith.constant 0 : index
    %2 = vector.load %arg3[%c0_3, %c0_4] : memref<8x1xf32, #tpu.memory_space<vmem>>, vector<8x1xf32>
    %c0_5 = arith.constant 0 : index
    %c0_6 = arith.constant 0 : index
    %3 = vector.load %arg4[%c0_5, %c0_6] : memref<1x512xi32, #tpu.memory_space<vmem>>, vector<1x512xi32>
    %cst = arith.constant dense<0.000000e+00> : vector<8x512xf32>
    %4 = tpu.matmul %1, %0, %cst {dimension_numbers = #tpu.dot_dimension_numbers<[1], [0], [0], [1], [0, 0, 1, 1], [], []>} : vector<8x512xbf16>, vector<512x512xbf16>, vector<8x512xf32> -> vector<8x512xf32>
    %cst_7 = arith.constant 2.000000e+00 : f32
    %5 = vector.broadcast %cst_7 : f32 to vector<8x512xf32>
    %6 = arith.mulf %5, %4 : vector<8x512xf32>
    %7 = vector.broadcast %2 : vector<8x1xf32> to vector<8x512xf32>
    %8 = arith.subf %7, %6 : vector<8x512xf32>
    %9 = tpu.iota {dimensions = array<i32: 0>} : vector<8x512xi32>
    %10 = vector.broadcast %3 : vector<1x512xi32> to vector<8x512xi32>
    %11 = arith.cmpi eq, %9, %10 : vector<8x512xi32>
    %cst_8 = arith.constant 0.000000e+00 : f32
    %12 = vector.broadcast %cst_8 : f32 to vector<8x512xf32>
    %13 = arith.select %11, %8, %12 : vector<8x512xi1>, vector<8x512xf32>
    %cst_9 = arith.constant dense<0.000000e+00> : vector<512xf32>
    %14 = vector.multi_reduction <add>, %13, %cst_9 [0] : vector<8x512xf32> to vector<512xf32>
    %15 = vector.shape_cast %14 : vector<512xf32> to vector<1x512xf32>
    %16 = vector.broadcast %15 : vector<1x512xf32> to vector<8x512xf32>
    %17 = arith.cmpf olt, %8, %16 : vector<8x512xf32>
    %18 = arith.extui %17 : vector<8x512xi1> to vector<8x512xi32>
    %19 = arith.sitofp %18 : vector<8x512xi32> to vector<8x512xf32>
    %cst_10 = arith.constant dense<0.000000e+00> : vector<512xf32>
    %20 = vector.multi_reduction <add>, %19, %cst_10 [0] : vector<8x512xf32> to vector<512xf32>
    %21 = vector.shape_cast %20 : vector<512xf32> to vector<1x512xf32>
    %cst_11 = arith.constant 0.142857149 : f32
    %22 = vector.broadcast %cst_11 : f32 to vector<1x512xf32>
    %23 = arith.mulf %21, %22 : vector<1x512xf32>
    %c0_12 = arith.constant 0 : index
    %c0_13 = arith.constant 0 : index
    %24 = vector.load %arg5[%c0_12, %c0_13] : memref<1x512xf32, #tpu.memory_space<vmem>>, vector<1x512xf32>
    tpu.vector_store %arg5[%c0_12, %c0_13], %23 {strides = array<i32>} : memref<1x512xf32, #tpu.memory_space<vmem>>, vector<1x512xf32>,
    return
  }
  func.func @transform_0(%arg0: i32) -> (i32, i32) {
    %c0_i32 = arith.constant 0 : i32
    %c0_i32_0 = arith.constant 0 : i32
    return %c0_i32, %arg0 : i32, i32
  }
  func.func @transform_1(%arg0: i32) -> (i32, i32) {
    %c0_i32 = arith.constant 0 : i32
    %c0_i32_0 = arith.constant 0 : i32
    %c0_i32_1 = arith.constant 0 : i32
    return %c0_i32, %c0_i32_0 : i32, i32
  }
  func.func @transform_2(%arg0: i32) -> (i32, i32) {
    %c0_i32 = arith.constant 0 : i32
    %c0_i32_0 = arith.constant 0 : i32
    %c0_i32_1 = arith.constant 0 : i32
    return %c0_i32, %c0_i32_0 : i32, i32
  }
  func.func @transform_3(%arg0: i32) -> (i32, i32) {
    %c0_i32 = arith.constant 0 : i32
    %c0_i32_0 = arith.constant 0 : i32
    return %c0_i32, %arg0 : i32, i32
  }
  func.func @transform_4(%arg0: i32) -> (i32, i32) {
    %c0_i32 = arith.constant 0 : i32
    %c0_i32_0 = arith.constant 0 : i32
    return %c0_i32, %arg0 : i32, i32
  }
}

</mosaic_0001>

<bundles_post_ra>
// kernel: tpu_custom_call.1
= control target key start
LH: loop header
LB: loop body
LE: loop exit
PB: predicated region body
PF: predicated region fallthrough
CT: control target
= control target key end

     0   :  { %9 = vsyncpa [#allocation3], 0  ;;  %s2381_s0 = inlined_call_operand.hbm [shape: bf16[512,1024], index: 0, kind: input, shape index: {}]   ;;  %s2382_s1 = inlined_call_operand.hbm [shape: bf16[8,512], index: 1, kind: input, shape index: {}]   ;;  %s2383_s2 = inlined_call_operand.vmem [shape: f32[8,1], index: 2, kind: input, shape index: {}]   ;;  %s2384_s3 = inlined_call_operand.vmem [shape: s32[1,1024], index: 3, kind: input, shape index: {}]   ;;  %s2385_s4 = inlined_call_operand.hbm [shape: f32[1,1024], index: 4, kind: output, shape index: {}]  }
   0x1   :  { %11 = vsyncpa [#allocation3 + $0x1], 0 }
   0x2   :  { %12 = vsyncpa [#allocation6], 0 }
   0x3   :  { %13 = vsyncpa [#allocation4], 0 }
   0x4   :  { %15 = vsyncpa [#allocation4 + $0x1], 0  ;;  %s2028_s15 = smov 0   ;;  %s2030_s16 = smov 0  }
   0x5   :  { %s2032_s17 = smov 0   ;;  %s2034_s18 = smov 0  }
   0x6 LB: > { %s2049_s19 = sadd.s32 4294967295, %s1992_s18   ;;  %s1441_s20 = sadd.s32 4294967294, %s1992_s18   ;;  %s1992_s18 = sphi %s2034_s18, %s2410_s18   ;;  %s1988_s17 = sphi %s2032_s17, %s2409_s17   ;;  %s1984_s16 = sphi %s2030_s16, %s2408_s16   ;;  %s1980_s15 = sphi %s2028_s15, %s2407_s15  }
   0x7   : > { %s2053_s21 = sadd.s32 1, %s1992_s18   ;;  %s28_s22 = sadd.s32 1, %s1988_s17 }
   0x8   : > { %s25_s23 = ssub.s32 %s1992_s18, %s2053_s21  ;;  %p35_p0 = scmp.ne.s32.totalorder %s1988_s17, %s1984_s16 }
   0x9   : > { %p26_p1 = scmp.eq.s32.totalorder %s25_s23, 0  ;;  %p36_p2 = scmp.eq.s32.totalorder %s1992_s18, 0 }
   0xa   : > { %p41_p3 = scmp.ne.s32.totalorder %s1984_s16, %s1980_s15  ;;  %p2386_p4 = scmp.eq.s32.totalorder %s2049_s19, 0 }
   0xb   : > { %s2065_s24 = scalar_select %p26_p1, %s1988_s17, %s28_s22  }
   0xc   : > { %p2067_p5 = por %p36_p2, %p35_p0  ;;  %p2073_p6 = por %p2386_p4, %p41_p3 }
   0xd   : > { %p133_p7 = scmp.eq.s32.totalorder %s2049_s19, 1  ;;  %p139_p8 = scmp.eq.s32.totalorder %s1441_s20, 1 }
   0xe   : > { %s2392_s26 = scalar_select %p2073_p6, 1, 0 }
   0xf   : > { %p1442_p9 = scmp.ge.s32.totalorder %s1992_s18, 1  ;;  %p146_p10 = scmp.lt.s32.totalorder %s1992_s18, 3 }
  0x10   : > { %p2080_p11 = por %p133_p7, %p35_p0  ;;  %p2084_p12 = por %p139_p8, %p41_p3 }
  0x11   : > { %p2088_p13 = pnand %p1442_p9, %p146_p10  ;;  %s1994_s30 = smov [#allocation5]  }
  0x12   : > { %s2393_s27 = scalar_select %p2080_p11, 1, 0 }
  0x13   : > { %s2394_s28 = scalar_select %p2084_p12, 1, 0 }
  0x14   : > { %s2395_s29 = scalar_select %p2088_p13, 1, 0 }
  0x15   : > { %p1612_p2 = pneg %p2088_p13  ;;  %s159_s5 = sshll.u32 %s1994_s30, 4  ;;  %s160_s5 = int_to_ptr.vmem [resolvable:$true] %s159_s5 }
  0x16   : > { %p1625_p4 = scmp.lt.s32.totalorder %s1992_s18, 2  ;;  %p2396_p0 = scmp.eq.s32.totalorder %s2049_s19, 0 }
  0x17   : > { %s173_s7 = sand.u32 1, %s1988_s17   ;;  %s1864_s12 = scalar_lea.hbm %s2382_s1, 256 }
  0x18   : > { %p2098_p7 = pnand %p1612_p2, %p2396_p0  ;;  %p2105_p3 = pnand %p1625_p4, %p2067_p5 }
  0x19   : > { %s1445_s9 = sshll.u32 %s173_s7, 10  ;;  %p1865_p8 = scmp.ne.s32.totalorder %s2382_s1, %s1864_s12 }
  0x1a   : > { %s2398_s8 = scalar_select %p2105_p3, 1, 0 }
  0x1b   : > { %p1866_p9 = pneg %p2098_p7  ;;  %p1871_p4 = scmp.lt.u32.totalorder %s1864_s12, %s2382_s1 }
  0x1d   : > { %p1867_p10 = pnand %p1866_p9, %p1865_p8 }
  0x1f   : > { %p1868_p2 = pneg %p1867_p10 }
  0x21   : > { %p1873_p5 = pnand %p1871_p4, %p1868_p2 }
  0x23   : > { %1876 = shalt.err (!%p1873_p5)
}
  0x24   : > { %s1877_s23 = scalar_lea.vmem %s160_s5, 256  ;;  %p1885_p11 = scmp.lt.s32.totalorder %s160_s5, %s160_s5 }
  0x25   : > { %p1878_p0 = scmp.ne.s32.totalorder %s160_s5, %s1877_s23  ;;  %p1886_p6 = scmp.lt.s32.totalorder %s1877_s23, %s1877_s23 }
  0x27   : > { %p1880_p1 = pnand %p1878_p0, %p1866_p9  ;;  %p1887_p13 = por %p1886_p6, %p1885_p11 }
  0x29   : > { %p1881_p12 = pneg %p1880_p1 }
  0x2b   : > { %p1888_p3 = pnand %p1887_p13, %p1881_p12 }
  0x2d   : > { %1891 = shalt.err (!%p1888_p3)
}
  0x2e   : > { %1615 = dma.hbm_to_vmem [thread:$0]  (!%p2098_p7), %s2382_s1, 256, %s160_s5, [#allocation6]  }
  0x2f   : > { %s1594_s10 = sshll.u32 %s1992_s18, 8  ;;  %s177_s11 = scalar_lea.vmem [#allocation2], %s1445_s9 }
  0x30   : > { %s184_s12 = sshll.u32 %s177_s11, 4  ;;  %s2129_s20 = scalar_lea.hbm %s2381_s0, %s1594_s10  ;;  %s2131_s12 = int_to_ptr.vmem [resolvable:$true] %s184_s12 }
  0x31   : > { %s2133_s6 = scalar_lea.sflag [#allocation3], %s173_s7  ;;  %s1892_s22 = scalar_lea.hbm %s2129_s20, 16384 }
  0x32   : > { %p1893_p6 = scmp.ne.s32.totalorder %s2129_s20, %s1892_s22  ;;  %p2399_p11 = scmp.ne.s32.totalorder %s2398_s8, 0 }
  0x33   : > { %s1897_s23 = scalar_lea.hbm %s2381_s0, 32768  ;;  %p1898_p7 = scmp.lt.u32.totalorder %s2129_s20, %s2381_s0 }
  0x34   : > { %p1894_p12 = pneg %p2399_p11  ;;  %p1899_p3 = scmp.lt.u32.totalorder %s1897_s23, %s1892_s22 }
  0x35   : > { %p1901_p9 = scmp.lt.u32.totalorder %s1892_s22, %s2129_s20 }
  0x36   : > { %p1895_p13 = pnand %p1894_p12, %p1893_p6  ;;  %p1900_p8 = por %p1899_p3, %p1898_p7 }
  0x38   : > { %p1896_p1 = pneg %p1895_p13  ;;  %p1902_p10 = por %p1901_p9, %p1900_p8 }
  0x3a   : > { %p1903_p2 = pnand %p1902_p10, %p1896_p1 }
  0x3c   : > { %1906 = shalt.err (!%p1903_p2)
}
  0x3d   : > { %s1907_s7 = scalar_lea.vmem %s2131_s12, 16384  ;;  %s1995_s10 = smov [#allocation2]  }
  0x3e   : > { %p1908_p4 = scmp.ne.s32.totalorder %s2131_s12, %s1907_s7  ;;  %s1912_s11 = sshll.u32 %s1995_s10, 4  ;;  %s1913_s11 = int_to_ptr.vmem [resolvable:$false] %s1912_s11 }
  0x3f   : > { %s1914_s13 = scalar_lea.vmem %s1913_s11, 32768  ;;  %p1915_p6 = scmp.lt.s32.totalorder %s2131_s12, %s1913_s11 }
  0x40   : > { %p1910_p5 = pnand %p1908_p4, %p1894_p12  ;;  %p1916_p13 = scmp.lt.s32.totalorder %s1914_s13, %s1907_s7 }
  0x42   : > { %p1911_p0 = pneg %p1910_p5  ;;  %p1917_p7 = por %p1916_p13, %p1915_p6 }
  0x44   : > { %p1918_p3 = pnand %p1917_p7, %p1911_p0 }
  0x46   : > { %1921 = shalt.err (!%p1918_p3)
}
  0x47   : > { %s1996_s14 = smov 512   ;;  %s1997_s22 = smov 256  }
  0x48   : > { %s1998_s5 = smov 16   ;;  %p2400_p12 = scmp.ne.s32.totalorder %s2395_s29, 0 }
  0x49   : > { %1619 = dma.hbm_to_vmem [thread:$0]  (!%p2399_p11), %s2129_s20, 16384, %s2131_s12, %s2133_s6, %s1996_s14, %s1997_s22, %s1998_s5  }
  0x4a   : > { %204 = sbr.rel (%p2400_p12) target bundleno = 482 (0x1e2), region = 36  ;;  %s2164_s9 = sand.u32 (!%p2400_p12), 1, %s1984_s16  }
  0x4b   : > { %s1449_s23 = sshll.u32 (!%p2400_p12), %s2164_s9, 10  ;;  %s207_s25 = scalar_lea.sflag (!%p2400_p12), [#allocation3], %s2164_s9 }
  0x4c   : > { %s2168_s30 = scalar_lea.vmem (!%p2400_p12), [#allocation2], %s1449_s23  ;;  %p2401_p1 = scmp.ne.s32.totalorder (!%p2400_p12), %s2392_s26, 0 }
  0x51   : > { %1967 = dma.done.wait (%p2401_p1), %s207_s25, 16384  }
  0x52   : > { %1969 = vsyncadd (%p2401_p1), %s207_s25, 4294950912  ;;  %p2402_p11 = scmp.eq.s32.totalorder %s2049_s19, 0 }
  0x54   : > { %1971 = dma.done.wait (%p2402_p11), [#allocation6], 256   ;;  %p2403_p8 = pmov %p2402_p11 }
  0x55   : > { %v1668_v0 = vld [vmem:[%s2168_s30 + $0x4] ss:$16 sps:$4 sm:$0xff]   ;;  %v1670_v1 = vld [vmem:[%s2168_s30 + $0xc] ss:$16 sps:$4 sm:$0xff]   ;;  %v1672_v2 = vld [vmem:[%s2168_s30] ss:$16 sps:$4 sm:$0xff]  }
  0x56   : > { %1973 = vsyncadd (%p2403_p8), [#allocation6], 4294967040  ;;  %1036 = vmatprep.subr.bf16.mxu0 %v1668_v0  ;;  %v1673_v3 = vld [vmem:[%s2168_s30 + $0x8] ss:$16 sps:$4 sm:$0xff]   ;;  %1118 = vmatprep.subr.bf16.mxu1 %v1670_v1  ;;  %v1674_v4 = vld [vmem:[%s2168_s30 + $0x24] ss:$16 sps:$4 sm:$0xff]  }
  0x57   : > { %1037 = vmatpush1.bf16.msra.mxu0 %v1672_v2  ;;  %1119 = vmatpush1.bf16.msra.mxu1 %v1673_v3  ;;  %v1676_v5 = vld [vmem:[%s2168_s30 + $0x2c] ss:$16 sps:$4 sm:$0xff]   ;;  %v1678_v6 = vld [vmem:[%s2168_s30 + $0x20] ss:$16 sps:$4 sm:$0xff]   ;;  %v1679_v7 = vld [vmem:[%s2168_s30 + $0x28] ss:$16 sps:$4 sm:$0xff]  }
  0x58   : > { %1038 = vmatprep.subr.bf16.mxu0 %v1674_v4  ;;  %v1999_v8 = vmov 0   ;;  %1120 = vmatprep.subr.bf16.mxu1 %v1676_v5  ;;  %v1680_v9 = vld [vmem:[%s2168_s30 + $0x44] ss:$16 sps:$4 sm:$0xff]   ;;  %v1682_v10 = vld [vmem:[%s2168_s30 + $0x4c] ss:$16 sps:$4 sm:$0xff]   ;;  %s1452_s8 = sshll.u32 %s2049_s19, 2 }
  0x59   : > { %1667 = vset.pattern.permute.xlu0 %v1999_v8  ;;  %v1684_v11 = vld [vmem:[%s2168_s30 + $0x40] ss:$16 sps:$4 sm:$0xff]   ;;  %v1685_v12 = vld [vmem:[%s2168_s30 + $0x48] ss:$16 sps:$4 sm:$0xff]   ;;  %v1686_v13 = vld [vmem:[%s2168_s30 + $0x64] ss:$16 sps:$4 sm:$0xff]  }
  0x5a   : > { %v1688_v14 = vld [vmem:[%s2168_s30 + $0x6c] ss:$16 sps:$4 sm:$0xff]   ;;  %v1690_v15 = vld [vmem:[%s2168_s30 + $0x60] ss:$16 sps:$4 sm:$0xff]   ;;  %v1691_v16 = vld [vmem:[%s2168_s30 + $0x68] ss:$16 sps:$4 sm:$0xff]  }
  0x5b   : > { %1039 = vmatpush1.bf16.msra.mxu0 %v1678_v6  ;;  %1121 = vmatpush1.bf16.msra.mxu1 %v1679_v7  ;;  %v1692_v17 = vld [vmem:[%s2168_s30 + $0x84] ss:$16 sps:$4 sm:$0xff]   ;;  %v1694_v18 = vld [vmem:[%s2168_s30 + $0x8c] ss:$16 sps:$4 sm:$0xff]   ;;  %v1696_v19 = vld [vmem:[%s2168_s30 + $0x80] ss:$16 sps:$4 sm:$0xff]  }
  0x5c   : > { %1040 = vmatprep.subr.bf16.mxu0 %v1680_v9  ;;  %1122 = vmatprep.subr.bf16.mxu1 %v1682_v10  ;;  %v1697_v20 = vld [vmem:[%s2168_s30 + $0x88] ss:$16 sps:$4 sm:$0xff]   ;;  %v1698_v21 = vld [vmem:[%s2168_s30 + $0xa4] ss:$16 sps:$4 sm:$0xff]   ;;  %v1700_v22 = vld [vmem:[%s2168_s30 + $0xac] ss:$16 sps:$4 sm:$0xff]  }
  0x5d   : > { %v1702_v23 = vld [vmem:[%s2168_s30 + $0xa0] ss:$16 sps:$4 sm:$0xff]   ;;  %v1703_v24 = vld [vmem:[%s2168_s30 + $0xa8] ss:$16 sps:$4 sm:$0xff]   ;;  %v1704_v25 = vld [vmem:[%s2168_s30 + $0xc4] ss:$16 sps:$4 sm:$0xff]  }
  0x5e   : > { %v1706_v26 = vld [vmem:[%s2168_s30 + $0xcc] ss:$16 sps:$4 sm:$0xff]   ;;  %v1708_v27 = vld [vmem:[%s2168_s30 + $0xc0] ss:$16 sps:$4 sm:$0xff]   ;;  %v1709_v28 = vld [vmem:[%s2168_s30 + $0xc8] ss:$16 sps:$4 sm:$0xff]  }
  0x5f   : > { %1041 = vmatpush1.bf16.msra.mxu0 %v1684_v11  ;;  %1123 = vmatpush1.bf16.msra.mxu1 %v1685_v12  ;;  %v1710_v29 = vld [vmem:[%s2168_s30 + $0xe4] ss:$16 sps:$4 sm:$0xff]   ;;  %v1712_v30 = vld [vmem:[%s2168_s30 + $0xec] ss:$16 sps:$4 sm:$0xff]   ;;  %v1714_v31 = vld [vmem:[%s2168_s30 + $0xe0] ss:$16 sps:$4 sm:$0xff]  }
  0x60   : > { %1042 = vmatprep.subr.bf16.mxu0 %v1686_v13  ;;  %1124 = vmatprep.subr.bf16.mxu1 %v1688_v14  ;;  %v1715_v32 = vld [vmem:[%s2168_s30 + $0xe8] ss:$16 sps:$4 sm:$0xff]   ;;  %v1716_v33 = vld [vmem:[%s2168_s30 + $0x104] ss:$16 sps:$4 sm:$0xff]   ;;  %v1718_v34 = vld [vmem:[%s2168_s30 + $0x10c] ss:$16 sps:$4 sm:$0xff]  }
  0x61   : > { %v1720_v35 = vld [vmem:[%s2168_s30 + $0x100] ss:$16 sps:$4 sm:$0xff]   ;;  %v1721_v36 = vld [vmem:[%s2168_s30 + $0x108] ss:$16 sps:$4 sm:$0xff]   ;;  %v1722_v37 = vld [vmem:[%s2168_s30 + $0x124] ss:$16 sps:$4 sm:$0xff]  }
  0x62   : > { %v1724_v38 = vld [vmem:[%s2168_s30 + $0x12c] ss:$16 sps:$4 sm:$0xff]   ;;  %v1726_v39 = vld [vmem:[%s2168_s30 + $0x120] ss:$16 sps:$4 sm:$0xff]   ;;  %v1727_v40 = vld [vmem:[%s2168_s30 + $0x128] ss:$16 sps:$4 sm:$0xff]  }
  0x63   : > { %1043 = vmatpush1.bf16.msra.mxu0 %v1690_v15  ;;  %1125 = vmatpush1.bf16.msra.mxu1 %v1691_v16  ;;  %v1728_v41 = vld [vmem:[%s2168_s30 + $0x144] ss:$16 sps:$4 sm:$0xff]   ;;  %v1730_v42 = vld [vmem:[%s2168_s30 + $0x14c] ss:$16 sps:$4 sm:$0xff]   ;;  %v1732_v43 = vld [vmem:[%s2168_s30 + $0x140] ss:$16 sps:$4 sm:$0xff]  }
  0x64   : > { %1044 = vmatprep.subr.bf16.mxu0 %v1692_v17  ;;  %1126 = vmatprep.subr.bf16.mxu1 %v1694_v18  ;;  %v1733_v44 = vld [vmem:[%s2168_s30 + $0x148] ss:$16 sps:$4 sm:$0xff]   ;;  %v1734_v45 = vld [vmem:[%s2168_s30 + $0x164] ss:$16 sps:$4 sm:$0xff]   ;;  %v1736_v46 = vld [vmem:[%s2168_s30 + $0x16c] ss:$16 sps:$4 sm:$0xff]  }
  0x65   : > { %v378_v47 = vld [vmem:[#allocation5] sm:$0xff]  ;;  %v1739_v50 = vld [vmem:[%s2168_s30 + $0x168] ss:$16 sps:$4 sm:$0xff]   ;;  %v1742_v52 = vld [vmem:[%s2168_s30 + $0x18c] ss:$16 sps:$4 sm:$0xff]   ;;  %p245_p9 = scmp.lt.s32.totalorder %s1452_s8, 7 }
  0x66   : > { %v1738_v48 = vld [vmem:[%s2168_s30 + $0x160] ss:$16 sps:$4 sm:$0xff]   ;;  %v1454_v49 = vcombine.high %v378_v47, %v378_v47  ;;  %v1740_v51 = vld [vmem:[%s2168_s30 + $0x184] ss:$16 sps:$4 sm:$0xff]   ;;  %v1745_v54 = vld [vmem:[%s2168_s30 + $0x188] ss:$16 sps:$4 sm:$0xff]   ;;  %v1453_v5 = vcombine.low %v378_v47, %v378_v47 }
  0x67   : > { %1045 = vmatpush1.bf16.msra.mxu0 %v1696_v19  ;;  %1127 = vmatpush1.bf16.msra.mxu1 %v1697_v20  ;;  %v1744_v53 = vld [vmem:[%s2168_s30 + $0x180] ss:$16 sps:$4 sm:$0xff]   ;;  %v1746_v55 = vld [vmem:[%s2168_s30 + $0x1a4] ss:$16 sps:$4 sm:$0xff]   ;;  %v1748_v56 = vld [vmem:[%s2168_s30 + $0x1ac] ss:$16 sps:$4 sm:$0xff]  }
  0x68   : > { %1046 = vmatprep.subr.bf16.mxu0 %v1698_v21  ;;  %1128 = vmatprep.subr.bf16.mxu1 %v1700_v22  ;;  %v1750_v57 = vld [vmem:[%s2168_s30 + $0x1a0] ss:$16 sps:$4 sm:$0xff]   ;;  %v1751_v58 = vld [vmem:[%s2168_s30 + $0x1a8] ss:$16 sps:$4 sm:$0xff]   ;;  %v1752_v59 = vld [vmem:[%s2168_s30 + $0x1c4] ss:$16 sps:$4 sm:$0xff]  }
  0x69   : > { %1068 = vmatprep.mubr.bf16.mxu0 %v1454_v49  ;;  %1150 = vmatprep.mubr.bf16.mxu1 %v1454_v49  ;;  %v1754_v60 = vld [vmem:[%s2168_s30 + $0x1cc] ss:$16 sps:$4 sm:$0xff]   ;;  %v1756_v61 = vld [vmem:[%s2168_s30 + $0x1c0] ss:$16 sps:$4 sm:$0xff]   ;;  %v1757_v62 = vld [vmem:[%s2168_s30 + $0x1c8] ss:$16 sps:$4 sm:$0xff]  }
  0x6a   : > { %v1758_v63 = vld [vmem:[%s2168_s30 + $0x1e4] ss:$16 sps:$4 sm:$0xff]   ;;  %v1760_v0 = vld [vmem:[%s2168_s30 + $0x1ec] ss:$16 sps:$4 sm:$0xff]   ;;  %v1762_v1 = vld [vmem:[%s2168_s30 + $0x1e0] ss:$16 sps:$4 sm:$0xff]  }
  0x6b   : > { %1047 = vmatpush1.bf16.msra.mxu0 %v1702_v23  ;;  %1129 = vmatpush1.bf16.msra.mxu1 %v1703_v24  ;;  %v1763_v2 = vld [vmem:[%s2168_s30 + $0x1e8] ss:$16 sps:$4 sm:$0xff]   ;;  %v1768_v3 = vld [vmem:[%s2168_s30 + $0x204] ss:$16 sps:$4 sm:$0xff]   ;;  %v1771_v4 = vld [vmem:[%s2168_s30 + $0x20c] ss:$16 sps:$4 sm:$0xff]  }
  0x6c   : > { %1048 = vmatprep.subr.bf16.mxu0 %v1704_v25  ;;  %1130 = vmatprep.subr.bf16.mxu1 %v1706_v26  ;;  %v1766_v6 = vld [vmem:[%s2168_s30 + $0x200] ss:$16 sps:$4 sm:$0xff]   ;;  %v1769_v7 = vld [vmem:[%s2168_s30 + $0x208] ss:$16 sps:$4 sm:$0xff]   ;;  %v1774_v8 = vld [vmem:[%s2168_s30 + $0x224] ss:$16 sps:$4 sm:$0xff]  }
  0x6d   : > { %v1777_v9 = vld [vmem:[%s2168_s30 + $0x22c] ss:$16 sps:$4 sm:$0xff]   ;;  %v1772_v10 = vld [vmem:[%s2168_s30 + $0x220] ss:$16 sps:$4 sm:$0xff]   ;;  %v1775_v11 = vld [vmem:[%s2168_s30 + $0x228] ss:$16 sps:$4 sm:$0xff]  }
  0x6e   : > { %v1780_v12 = vld [vmem:[%s2168_s30 + $0x244] ss:$16 sps:$4 sm:$0xff]   ;;  %v1783_v13 = vld [vmem:[%s2168_s30 + $0x24c] ss:$16 sps:$4 sm:$0xff]   ;;  %v1778_v14 = vld [vmem:[%s2168_s30 + $0x240] ss:$16 sps:$4 sm:$0xff]  }
  0x6f   : > { %1049 = vmatpush1.bf16.msra.mxu0 %v1708_v27  ;;  %1131 = vmatpush1.bf16.msra.mxu1 %v1709_v28  ;;  %v1781_v15 = vld [vmem:[%s2168_s30 + $0x248] ss:$16 sps:$4 sm:$0xff]   ;;  %v1786_v16 = vld [vmem:[%s2168_s30 + $0x264] ss:$16 sps:$4 sm:$0xff]   ;;  %v1789_v17 = vld [vmem:[%s2168_s30 + $0x26c] ss:$16 sps:$4 sm:$0xff]  }
  0x70   : > { %1050 = vmatprep.subr.bf16.mxu0 %v1710_v29  ;;  %1132 = vmatprep.subr.bf16.mxu1 %v1712_v30  ;;  %v1784_v18 = vld [vmem:[%s2168_s30 + $0x260] ss:$16 sps:$4 sm:$0xff]   ;;  %v1787_v19 = vld [vmem:[%s2168_s30 + $0x268] ss:$16 sps:$4 sm:$0xff]   ;;  %v1792_v20 = vld [vmem:[%s2168_s30 + $0x284] ss:$16 sps:$4 sm:$0xff]  }
  0x71   : > { %v1795_v21 = vld [vmem:[%s2168_s30 + $0x28c] ss:$16 sps:$4 sm:$0xff]   ;;  %v1790_v22 = vld [vmem:[%s2168_s30 + $0x280] ss:$16 sps:$4 sm:$0xff]   ;;  %v1793_v23 = vld [vmem:[%s2168_s30 + $0x288] ss:$16 sps:$4 sm:$0xff]  }
  0x72   : > { %v1798_v24 = vld [vmem:[%s2168_s30 + $0x2a4] ss:$16 sps:$4 sm:$0xff]   ;;  %v1801_v25 = vld [vmem:[%s2168_s30 + $0x2ac] ss:$16 sps:$4 sm:$0xff]   ;;  %v1796_v26 = vld [vmem:[%s2168_s30 + $0x2a0] ss:$16 sps:$4 sm:$0xff]  }
  0x73   : > { %1051 = vmatpush1.bf16.msra.mxu0 %v1714_v31  ;;  %1133 = vmatpush1.bf16.msra.mxu1 %v1715_v32  ;;  %v1799_v27 = vld [vmem:[%s2168_s30 + $0x2a8] ss:$16 sps:$4 sm:$0xff]   ;;  %v1804_v28 = vld [vmem:[%s2168_s30 + $0x2c4] ss:$16 sps:$4 sm:$0xff]   ;;  %v1807_v29 = vld [vmem:[%s2168_s30 + $0x2cc] ss:$16 sps:$4 sm:$0xff]  }
  0x74   : > { %1052 = vmatprep.subr.bf16.mxu0 %v1716_v33  ;;  %1134 = vmatprep.subr.bf16.mxu1 %v1718_v34  ;;  %v2268_v30 = vld [vmem:[#allocation5 + $0x8] sm:$0xff]  ;;  %v380_v32 = vld [vmem:[%s2383_s2] sm:$0xff]  ;;  %s2412_s8 = smov (!%p245_p9, %s1452_s8), 7  ;;  %s1451_s7 = sshll.u32 %s2164_s9, 2 }
  0x75   : > { %v1456_v31 = vcombine.high %v2268_v30, %v2268_v30  ;;  %1206 = vperm.xlu0 %1667, %v380_v32   ;;  %v1802_v33 = vld [vmem:[%s2168_s30 + $0x2c0] ss:$16 sps:$4 sm:$0xff]   ;;  %v1805_v34 = vld [vmem:[%s2168_s30 + $0x2c8] ss:$16 sps:$4 sm:$0xff]   ;;  %v1828_v47 = vld [vmem:[%s2168_s30 + $0x344] ss:$16 sps:$4 sm:$0xff]   ;;  %s247_s6 = scalar_lea.vmem %s2384_s3, %s2412_s8 }
  0x76   : > { %v1826_v49 = vld [vmem:[%s2168_s30 + $0x340] ss:$16 sps:$4 sm:$0xff]   ;;  %s1595_s10 = sshll.u32 %s2049_s19, 6  ;;  %s242_s11 = scalar_lea.vmem [#allocation7], %s1451_s7 }
  0x77   : > { %1053 = vmatpush1.bf16.msra.mxu0 %v1720_v35  ;;  %1135 = vmatpush1.bf16.msra.mxu1 %v1721_v36  ;;  %v1810_v35 = vld [vmem:[%s2168_s30 + $0x2e4] ss:$16 sps:$4 sm:$0xff]   ;;  %v1813_v36 = vld [vmem:[%s2168_s30 + $0x2ec] ss:$16 sps:$4 sm:$0xff]   ;;  %s1352_s13 = sshll.u32 %s242_s11, 4  ;;  %s2337_s5 = scalar_lea.hbm %s2385_s4, %s1595_s10  ;;  %s2339_s13 = int_to_ptr.vmem [resolvable:$true] %s1352_s13 }
  0x78   : > { %1054 = vmatprep.subr.bf16.mxu0 %v1722_v37  ;;  %1136 = vmatprep.subr.bf16.mxu1 %v1724_v38  ;;  %v1808_v37 = vld [vmem:[%s2168_s30 + $0x2e0] ss:$16 sps:$4 sm:$0xff]   ;;  %v1811_v38 = vld [vmem:[%s2168_s30 + $0x2e8] ss:$16 sps:$4 sm:$0xff]   ;;  %s1338_s23 = scalar_lea.sflag [#allocation4], %s2164_s9  ;;  %s1922_s25 = scalar_lea.vmem %s2339_s13, 64 }
  0x79   : > { %p1923_p10 = scmp.ne.s32.totalorder %s2339_s13, %s1922_s25  ;;  %p2404_p2 = scmp.ne.s32.totalorder %s2393_s27, 0 }
  0x7a   : > { %s2002_s19 = smov [#allocation7]  }
  0x7b   : > { %1055 = vmatpush1.bf16.msra.mxu0 %v1726_v39  ;;  %1137 = vmatpush1.bf16.msra.mxu1 %v1727_v40  ;;  %v1816_v39 = vld [vmem:[%s2168_s30 + $0x304] ss:$16 sps:$4 sm:$0xff]   ;;  %v1819_v40 = vld [vmem:[%s2168_s30 + $0x30c] ss:$16 sps:$4 sm:$0xff]   ;;  %p1924_p4 = pnand %p1923_p10, %p2404_p2 }
  0x7c   : > { %1056 = vmatprep.subr.bf16.mxu0 %v1728_v41  ;;  %1138 = vmatprep.subr.bf16.mxu1 %v1730_v42  ;;  %v1814_v41 = vld [vmem:[%s2168_s30 + $0x300] ss:$16 sps:$4 sm:$0xff]   ;;  %v1817_v42 = vld [vmem:[%s2168_s30 + $0x308] ss:$16 sps:$4 sm:$0xff]  }
  0x7d   : > { %p1925_p5 = pneg %p1924_p4 }
  0x7f   : > { %1057 = vmatpush1.bf16.msra.mxu0 %v1732_v43  ;;  %1139 = vmatpush1.bf16.msra.mxu1 %v1733_v44  ;;  %v1822_v43 = vld [vmem:[%s2168_s30 + $0x324] ss:$16 sps:$4 sm:$0xff]   ;;  %v1825_v44 = vld [vmem:[%s2168_s30 + $0x32c] ss:$16 sps:$4 sm:$0xff]  }
  0x80   : > { %1058 = vmatprep.subr.bf16.mxu0 %v1734_v45  ;;  %1140 = vmatprep.subr.bf16.mxu1 %v1736_v46  ;;  %v1820_v45 = vld [vmem:[%s2168_s30 + $0x320] ss:$16 sps:$4 sm:$0xff]   ;;  %v1823_v46 = vld [vmem:[%s2168_s30 + $0x328] ss:$16 sps:$4 sm:$0xff]  }
  0x83   : > { %1059 = vmatpush1.bf16.msra.mxu0 %v1738_v48  ;;  %1141 = vmatpush1.bf16.msra.mxu1 %v1739_v50  ;;  %v1831_v48 = vld [vmem:[%s2168_s30 + $0x34c] ss:$16 sps:$4 sm:$0xff]   ;;  %v1829_v50 = vld [vmem:[%s2168_s30 + $0x348] ss:$16 sps:$4 sm:$0xff]  }
  0x84   : > { %1060 = vmatprep.subr.bf16.mxu0 %v1740_v51  ;;  %1142 = vmatprep.subr.bf16.mxu1 %v1742_v52  ;;  %v1834_v51 = vld [vmem:[%s2168_s30 + $0x364] ss:$16 sps:$4 sm:$0xff]   ;;  %v1837_v52 = vld [vmem:[%s2168_s30 + $0x36c] ss:$16 sps:$4 sm:$0xff]  }
  0x87   : > { %1061 = vmatpush1.bf16.msra.mxu0 %v1744_v53  ;;  %1143 = vmatpush1.bf16.msra.mxu1 %v1745_v54  ;;  %v1832_v53 = vld [vmem:[%s2168_s30 + $0x360] ss:$16 sps:$4 sm:$0xff]   ;;  %v1835_v54 = vld [vmem:[%s2168_s30 + $0x368] ss:$16 sps:$4 sm:$0xff]  }
  0x88   : > { %1062 = vmatprep.subr.bf16.mxu0 %v1746_v55  ;;  %1144 = vmatprep.subr.bf16.mxu1 %v1748_v56  ;;  %v1840_v55 = vld [vmem:[%s2168_s30 + $0x384] ss:$16 sps:$4 sm:$0xff]   ;;  %v1843_v56 = vld [vmem:[%s2168_s30 + $0x38c] ss:$16 sps:$4 sm:$0xff]  }
  0x8b   : > { %1063 = vmatpush1.bf16.msra.mxu0 %v1750_v57  ;;  %1145 = vmatpush1.bf16.msra.mxu1 %v1751_v58  ;;  %v1838_v57 = vld [vmem:[%s2168_s30 + $0x380] ss:$16 sps:$4 sm:$0xff]   ;;  %v1841_v58 = vld [vmem:[%s2168_s30 + $0x388] ss:$16 sps:$4 sm:$0xff]  }
  0x8c   : > { %1064 = vmatprep.subr.bf16.mxu0 %v1752_v59  ;;  %1146 = vmatprep.subr.bf16.mxu1 %v1754_v60  ;;  %v1846_v59 = vld [vmem:[%s2168_s30 + $0x3a4] ss:$16 sps:$4 sm:$0xff]   ;;  %v1849_v60 = vld [vmem:[%s2168_s30 + $0x3ac] ss:$16 sps:$4 sm:$0xff]  }
  0x8f   : > { %1065 = vmatpush1.bf16.msra.mxu0 %v1756_v61  ;;  %1147 = vmatpush1.bf16.msra.mxu1 %v1757_v62  ;;  %v1844_v61 = vld [vmem:[%s2168_s30 + $0x3a0] ss:$16 sps:$4 sm:$0xff]   ;;  %v1847_v62 = vld [vmem:[%s2168_s30 + $0x3a8] ss:$16 sps:$4 sm:$0xff]  }
  0x90   : > { %1066 = vmatprep.subr.bf16.mxu0 %v1758_v63  ;;  %1148 = vmatprep.subr.bf16.mxu1 %v1760_v0  ;;  %v1852_v63 = vld [vmem:[%s2168_s30 + $0x3c4] ss:$16 sps:$4 sm:$0xff]   ;;  %v1855_v0 = vld [vmem:[%s2168_s30 + $0x3cc] ss:$16 sps:$4 sm:$0xff]  }
  0x93   : > { %1067 = vmatpush1.bf16.msra.mxu0 %v1762_v1  ;;  %1149 = vmatpush1.bf16.msra.mxu1 %v1763_v2  ;;  %v1850_v1 = vld [vmem:[%s2168_s30 + $0x3c0] ss:$16 sps:$4 sm:$0xff]   ;;  %v1853_v2 = vld [vmem:[%s2168_s30 + $0x3c8] ss:$16 sps:$4 sm:$0xff]  }
  0x94   : > { %1077 = vmatprep.subr.bf16.mxu0 %v1768_v3  ;;  %1159 = vmatprep.subr.bf16.mxu1 %v1771_v4  ;;  %v1858_v3 = vld [vmem:[%s2168_s30 + $0x3e4] ss:$16 sps:$4 sm:$0xff]   ;;  %v1861_v4 = vld [vmem:[%s2168_s30 + $0x3ec] ss:$16 sps:$4 sm:$0xff]  }
  0x96   : > { %1069 = vmatmul.mubr.bf16.vlgmr.msra.gmra.mrb[0].mxu0 %v1453_v5  ;;  %1151 = vmatmul.mubr.bf16.vlgmr.msra.gmra.mrb[0].mxu1 %v1453_v5  ;;  %v1856_v5 = vld [vmem:[%s2168_s30 + $0x3e0] ss:$16 sps:$4 sm:$0xff]  }
  0x97   : > { %1078 = vmatpush1.bf16.msra.mxu0 %v1766_v6  ;;  %1160 = vmatpush1.bf16.msra.mxu1 %v1769_v7  ;;  %v1859_v6 = vld [vmem:[%s2168_s30 + $0x3e8] ss:$16 sps:$4 sm:$0xff]   ;;  %v1455_v7 = vcombine.low %v2268_v30, %v2268_v30  ;;  %s1926_s30 = sshll.u32 %s2002_s19, 4  ;;  %s1927_s30 = int_to_ptr.vmem [resolvable:$false] %s1926_s30 }
  0x98   : > { %1079 = vmatprep.subr.bf16.mxu0 %v1774_v8  ;;  %1161 = vmatprep.subr.bf16.mxu1 %v1777_v9  ;;  %v1213_v8 = vlaneseq  ;;  %s1928_s26 = scalar_lea.vmem %s1927_s30, 128  ;;  %p1929_p0 = scmp.lt.s32.totalorder %s2339_s13, %s1927_s30 }
  0x99   : > { %1109 = vmatprep.mubr.bf16.mxu0 %v1456_v31  ;;  %1191 = vmatprep.mubr.bf16.mxu1 %v1456_v31  ;;  %p1930_p6 = scmp.lt.s32.totalorder %s1928_s26, %s1922_s25 }
  0x9a   : > { %v2317_v9 = vshrl.u32 %v1213_v8, 7  ;;  %vm1334_vm8 = vcmp.lt.s32.totalorder %v1213_v8, 512 }
  0x9b   : > { %1080 = vmatpush1.bf16.msra.mxu0 %v1772_v10  ;;  %1162 = vmatpush1.bf16.msra.mxu1 %v1775_v11  ;;  %p1931_p13 = por %p1930_p6, %p1929_p0 }
  0x9c   : > { %1081 = vmatprep.subr.bf16.mxu0 %v1780_v12  ;;  %1163 = vmatprep.subr.bf16.mxu1 %v1783_v13  ;;  %v1217_v10 = vsub.s32 0, %v2317_v9  ;;  %v1225_v11 = vsub.s32 2, %v2317_v9  ;;  %v381_v12 = vld [vmem:[%s247_s6] sm:$0xf]  ;;  %v1221_v13 = vsub.s32 1, %v2317_v9 }
  0x9d   : > { %p1932_p7 = pnand %p1931_p13, %p1925_p5 }
  0x9f   : > { %1082 = vmatpush1.bf16.msra.mxu0 %v1778_v14  ;;  %1164 = vmatpush1.bf16.msra.mxu1 %v1781_v15  ;;  %v1229_v14 = vsub.s32 3, %v2317_v9  ;;  %v1218_v15 = vrot.slane %v381_v12, %v1217_v10 }
  0xa0   : > { %1083 = vmatprep.subr.bf16.mxu0 %v1786_v16  ;;  %1165 = vmatprep.subr.bf16.mxu1 %v1789_v17  ;;  %v1226_v16 = vrot.slane %v381_v12, %v1225_v11  ;;  %v1222_v17 = vrot.slane %v381_v12, %v1221_v13 }
  0xa1   : > { %vm1231_vm0 = vcmp.eq.s32.totalorder %v2317_v9, %v1218_v15 }
  0xa2   : > { %vm1233_vm1 = vcmp.eq.s32.totalorder %v2317_v9, %v1226_v16  ;;  %vm1232_vm2 = vcmp.eq.s32.totalorder %v2317_v9, %v1222_v17  ;;  %v2001_v17 = vmov 1966171168  }
  0xa3   : > { %1084 = vmatpush1.bf16.msra.mxu0 %v1784_v18  ;;  %1166 = vmatpush1.bf16.msra.mxu1 %v1787_v19  ;;  %v1230_v18 = vrot.slane %v381_v12, %v1229_v14 }
  0xa4   : > { %1085 = vmatprep.subr.bf16.mxu0 %v1792_v20  ;;  %1167 = vmatprep.subr.bf16.mxu1 %v1795_v21 }
  0xa5   : > { %vm1234_vm3 = vcmp.eq.s32.totalorder %v2317_v9, %v1230_v18  ;;  %v1310_v18 = vunpack.c.l.s4 %v2001_v17 }
  0xa7   : > { %1086 = vmatpush1.bf16.msra.mxu0 %v1790_v22  ;;  %1168 = vmatpush1.bf16.msra.mxu1 %v1793_v23 }
  0xa8   : > { %1087 = vmatprep.subr.bf16.mxu0 %v1798_v24  ;;  %1169 = vmatprep.subr.bf16.mxu1 %v1801_v25 }
  0xab   : > { %1088 = vmatpush1.bf16.msra.mxu0 %v1796_v26  ;;  %1170 = vmatpush1.bf16.msra.mxu1 %v1799_v27 }
  0xac   : > { %1089 = vmatprep.subr.bf16.mxu0 %v1804_v28  ;;  %1171 = vmatprep.subr.bf16.mxu1 %v1807_v29 }
  0xaf   : > { %1090 = vmatpush1.bf16.msra.mxu0 %v1802_v33  ;;  %1172 = vmatpush1.bf16.msra.mxu1 %v1805_v34 }
  0xb0   : > { %1091 = vmatprep.subr.bf16.mxu0 %v1810_v35  ;;  %1173 = vmatprep.subr.bf16.mxu1 %v1813_v36 }
  0xb3   : > { %1092 = vmatpush1.bf16.msra.mxu0 %v1808_v37  ;;  %1174 = vmatpush1.bf16.msra.mxu1 %v1811_v38 }
  0xb4   : > { %1093 = vmatprep.subr.bf16.mxu0 %v1816_v39  ;;  %1175 = vmatprep.subr.bf16.mxu1 %v1819_v40 }
  0xb7   : > { %1094 = vmatpush1.bf16.msra.mxu0 %v1814_v41  ;;  %1176 = vmatpush1.bf16.msra.mxu1 %v1817_v42 }
  0xb8   : > { %1095 = vmatprep.subr.bf16.mxu0 %v1822_v43  ;;  %1177 = vmatprep.subr.bf16.mxu1 %v1825_v44 }
  0xbb   : > { %1096 = vmatpush1.bf16.msra.mxu0 %v1820_v45  ;;  %1178 = vmatpush1.bf16.msra.mxu1 %v1823_v46 }
  0xbc   : > { %1097 = vmatprep.subr.bf16.mxu0 %v1828_v47  ;;  %1179 = vmatprep.subr.bf16.mxu1 %v1831_v48 }
  0xbf   : > { %1098 = vmatpush1.bf16.msra.mxu0 %v1826_v49  ;;  %1180 = vmatpush1.bf16.msra.mxu1 %v1829_v50 }
  0xc0   : > { %1099 = vmatprep.subr.bf16.mxu0 %v1834_v51  ;;  %1181 = vmatprep.subr.bf16.mxu1 %v1837_v52 }
  0xc3   : > { %1100 = vmatpush1.bf16.msra.mxu0 %v1832_v53  ;;  %1182 = vmatpush1.bf16.msra.mxu1 %v1835_v54 }
  0xc4   : > { %1101 = vmatprep.subr.bf16.mxu0 %v1840_v55  ;;  %1183 = vmatprep.subr.bf16.mxu1 %v1843_v56 }
  0xc7   : > { %1102 = vmatpush1.bf16.msra.mxu0 %v1838_v57  ;;  %1184 = vmatpush1.bf16.msra.mxu1 %v1841_v58 }
  0xc8   : > { %1103 = vmatprep.subr.bf16.mxu0 %v1846_v59  ;;  %1185 = vmatprep.subr.bf16.mxu1 %v1849_v60 }
  0xcb   : > { %1104 = vmatpush1.bf16.msra.mxu0 %v1844_v61  ;;  %1186 = vmatpush1.bf16.msra.mxu1 %v1847_v62 }
  0xcc   : > { %1105 = vmatprep.subr.bf16.mxu0 %v1852_v63  ;;  %1187 = vmatprep.subr.bf16.mxu1 %v1855_v0  ;;  %v2000_v0 = vmov 0.0  }
  0xcf   : > { %1106 = vmatpush1.bf16.msra.mxu0 %v1850_v1  ;;  %1188 = vmatpush1.bf16.msra.mxu1 %v1853_v2 }
  0xd0   : > { %1107 = vmatprep.subr.bf16.mxu0 %v1858_v3  ;;  %1189 = vmatprep.subr.bf16.mxu1 %v1861_v4 }
  0xd3   : > { %1108 = vmatpush1.bf16.msra.mxu0 %v1856_v5  ;;  %1190 = vmatpush1.bf16.msra.mxu1 %v1859_v6 }
  0xd6   : > { %1110 = vmatmul.mubr.bf16.vlgmr.msra.gmra.mrb[0].mxu0 %v1455_v7  ;;  %1192 = vmatmul.mubr.bf16.vlgmr.msra.gmra.mrb[0].mxu1 %v1455_v7 }
  0xf4   : > { %v1207_v19 = vpop.permute.xlu0 %1206 }
 0x1a9   : > { %v1111_v20 = vpop.f32.mrb[0].mxu0  ;;  %v1193_v21 = vpop.f32.mrb[0].mxu1 }
 0x1aa   : > { %v1200_v22 = vmul.f32 2.0, %v1111_v20  ;;  %v1202_v23 = vmul.f32 2.0, %v1193_v21  ;;  %v1113_v24 = vpop.f32.mrb[1].mxu0  ;;  %v1195_v25 = vpop.f32.mrb[1].mxu1 }
 0x1ab   : > { %v1201_v26 = vmul.f32 2.0, %v1113_v24  ;;  %v1203_v27 = vmul.f32 2.0, %v1195_v25  ;;  %v1115_v28 = vpop.f32.mrb[2].mxu0  ;;  %v1197_v29 = vpop.f32.mrb[2].mxu1 }
 0x1ac   : > { %v1209_v30 = vsub.f32 %v1207_v19, %v1200_v22  ;;  %v1211_v31 = vsub.f32 %v1207_v19, %v1202_v23  ;;  %v1116_v32 = vpop.f32.mrb[3].mxu0  ;;  %v1198_v33 = vpop.f32.mrb[3].mxu1 }
 0x1ad   : > { %v1210_v34 = vsub.f32 %v1207_v19, %v1201_v26  ;;  %v1212_v35 = vsub.f32 %v1207_v19, %v1203_v27  ;;  %v1311_v27 = vunpack.c.0.s8 %v1310_v18 }
 0x1ae   : > { %v1235_v36 = vsel %vm1231_vm0, %v1209_v30, 0.0  ;;  %v1237_v37 = vsel %vm1233_vm1, %v1211_v31, 0.0 }
 0x1af   : > { %v1236_v38 = vsel %vm1232_vm2, %v1210_v34, 0.0  ;;  %v1238_v39 = vsel %vm1234_vm3, %v1212_v35, 0.0  ;;  %v1239_v40 = vrot.slane %v1235_v36, 4  ;;  %v1251_v41 = vrot.slane %v1237_v37, 4 }
 0x1b0   : > { %v1245_v42 = vrot.slane %v1236_v38, 4  ;;  %v1257_v43 = vrot.slane %v1238_v39, 4 }
 0x1b1   : > { %v1240_v44 = vadd.f32 %v1239_v40, %v1235_v36  ;;  %v1252_v45 = vadd.f32 %v1251_v41, %v1237_v37  ;;  %v1314_v36 = vsub.s32 %v1311_v27, %v2317_v9 }
 0x1b2   : > { %v1246_v46 = vadd.f32 %v1245_v42, %v1236_v38  ;;  %v1258_v47 = vadd.f32 %v1257_v43, %v1238_v39 }
 0x1b3   : > { %v1241_v48 = vrot.slane %v1240_v44, 2  ;;  %v1253_v49 = vrot.slane %v1252_v45, 2 }
 0x1b4   : > { %v1247_v50 = vrot.slane %v1246_v46, 2  ;;  %v1259_v51 = vrot.slane %v1258_v47, 2 }
 0x1b5   : > { %v1242_v52 = vadd.f32 %v1241_v48, %v1240_v44  ;;  %v1254_v53 = vadd.f32 %v1253_v49, %v1252_v45 }
 0x1b6   : > { %v1248_v54 = vadd.f32 %v1247_v50, %v1246_v46  ;;  %v1260_v55 = vadd.f32 %v1259_v51, %v1258_v47 }
 0x1b7   : > { %v1243_v56 = vrot.slane %v1242_v52, 1  ;;  %v1255_v57 = vrot.slane %v1254_v53, 1 }
 0x1b8   : > { %v1249_v58 = vrot.slane %v1248_v54, 1  ;;  %v1261_v59 = vrot.slane %v1260_v55, 1 }
 0x1b9   : > { %v1244_v60 = vadd.f32 %v1243_v56, %v1242_v52  ;;  %v1256_v61 = vadd.f32 %v1255_v57, %v1254_v53 }
 0x1ba   : > { %v1250_v62 = vadd.f32 %v1249_v58, %v1248_v54  ;;  %v1262_v63 = vadd.f32 %v1261_v59, %v1260_v55 }
 0x1bb   : > { %vm1263_vm4 = vcmp.lt.f32.partialorder %v1209_v30, %v1244_v60  ;;  %vm1265_vm5 = vcmp.lt.f32.partialorder %v1211_v31, %v1256_v61 }
 0x1bc   : > { %vm1264_vm6 = vcmp.lt.f32.partialorder %v1210_v34, %v1250_v62  ;;  %vm1266_vm7 = vcmp.lt.f32.partialorder %v1212_v35, %v1262_v63  ;;  %v1585_v1 = vsel %vm1263_vm4, 1.0, %v2000_v0  ;;  %v1587_v2 = vsel %vm1265_vm5, 1.0, %v2000_v0 }
 0x1bd   : > { %v1586_v3 = vsel %vm1264_vm6, 1.0, %v2000_v0  ;;  %v1588_v4 = vsel %vm1266_vm7, 1.0, %v2000_v0  ;;  %v1275_v5 = vrot.slane %v1585_v1, 4  ;;  %v1287_v6 = vrot.slane %v1587_v2, 4 }
 0x1be   : > { %v1281_v7 = vrot.slane %v1586_v3, 4  ;;  %v1293_v10 = vrot.slane %v1588_v4, 4 }
 0x1bf   : > { %v1276_v11 = vadd.f32 %v1585_v1, %v1275_v5  ;;  %v1288_v12 = vadd.f32 %v1587_v2, %v1287_v6 }
 0x1c0   : > { %v1282_v13 = vadd.f32 %v1586_v3, %v1281_v7  ;;  %v1294_v14 = vadd.f32 %v1588_v4, %v1293_v10 }
 0x1c1   : > { %v1277_v15 = vrot.slane %v1276_v11, 2  ;;  %v1289_v16 = vrot.slane %v1288_v12, 2 }
 0x1c2   : > { %v1283_v19 = vrot.slane %v1282_v13, 2  ;;  %v1295_v20 = vrot.slane %v1294_v14, 2 }
 0x1c3   : > { %v1278_v21 = vadd.f32 %v1277_v15, %v1276_v11  ;;  %v1290_v22 = vadd.f32 %v1289_v16, %v1288_v12 }
 0x1c4   : > { %v1284_v23 = vadd.f32 %v1283_v19, %v1282_v13  ;;  %v1296_v24 = vadd.f32 %v1295_v20, %v1294_v14 }
 0x1c5   : > { %v1279_v25 = vrot.slane %v1278_v21, 1  ;;  %v1291_v26 = vrot.slane %v1290_v22, 1 }
 0x1c6   : > { %v1285_v28 = vrot.slane %v1284_v23, 1  ;;  %v1297_v29 = vrot.slane %v1296_v24, 1 }
 0x1c7   : > { %v1280_v30 = vadd.f32 %v1279_v25, %v1278_v21  ;;  %v1292_v31 = vadd.f32 %v1291_v26, %v1290_v22 }
 0x1c8   : > { %v1286_v32 = vadd.f32 %v1285_v28, %v1284_v23  ;;  %v1298_v33 = vadd.f32 %v1297_v29, %v1296_v24 }
 0x1c9   : > { %v1299_v34 = vmul.f32 0.14285715, %v1280_v30  ;;  %v1301_v35 = vmul.f32 0.14285715, %v1292_v31 }
 0x1ca   : > { %v1300_v37 = vmul.f32 0.14285715, %v1286_v32  ;;  %v1302_v38 = vmul.f32 0.14285715, %v1298_v33 }
 0x1cc   : > { %v1307_v39 = vcombine.low %v1299_v34, %v1300_v37  ;;  %v1308_v40 = vcombine.low %v1301_v35, %v1302_v38 }
 0x1ce   : > { %v1315_v41 = vrot.slane %v1307_v39, %v1314_v36  ;;  %v1322_v42 = vrot.slane %v1308_v40, %v1314_v36 }
 0x1d0   : > { %v1323_v43 = vcombine.low %v1315_v41, %v1322_v42 }
 0x1d2   : > { %v1330_v44 = vrot.slane %v1323_v43, %v1314_v36 }
 0x1d4   : > { %1336 = vst.msk [vmem:[%s242_s11] sm:$0xf] %vm1334_vm8, %v1330_v44 }
 0x1d5   : > { %1935 = shalt.err (!%p1932_p7)
}
 0x1d6   : > { %s1936_s9 = scalar_lea.hbm %s2337_s5, 64  ;;  %s1940_s12 = scalar_lea.hbm %s2385_s4, 128 }
 0x1d7   : > { %p1937_p3 = scmp.ne.s32.totalorder %s2337_s5, %s1936_s9  ;;  %p1941_p11 = scmp.lt.u32.totalorder %s2337_s5, %s2385_s4 }
 0x1d8   : > { %p1942_p8 = scmp.lt.u32.totalorder %s1940_s12, %s1936_s9  ;;  %p1944_p10 = scmp.lt.u32.totalorder %s1936_s9, %s2337_s5 }
 0x1d9   : > { %p1938_p12 = pnand %p1937_p3, %p2404_p2 }
 0x1da   : > { %p1943_p9 = por %p1942_p8, %p1941_p11 }
 0x1db   : > { %p1939_p1 = pneg %p1938_p12 }
 0x1dc   : > { %p1945_p4 = por %p1944_p10, %p1943_p9 }
 0x1de   : > { %p1946_p5 = pnand %p1945_p4, %p1939_p1 }
 0x1e0   : > { %1949 = shalt.err (!%p1946_p5)
}
 0x1e1   : > { %1610 = dma.vmem_to_hbm [thread:$0]  (%p2404_p2), %s2339_s13, 64, %s2337_s5, %s1338_s23  }
 0x1e2 PF: > { %s1364_s7 = sand.u32 1, %s1980_s15   ;;  %p2405_p0 = scmp.ne.s32.totalorder %s2394_s28, 0 }
 0x1e3   : > { %p2406_p6 = scmp.ge.s32.totalorder %s1992_s18, 2  ;;  %s1365_s10 = scalar_lea.sflag [#allocation4], %s1364_s7 }
 0x1e5   : > { %p1621_p13 = pnand %p2406_p6, %p2405_p0 }
 0x1e7   : > { %1975 = dma.done.wait (!%p1621_p13), %s1365_s10, 64  }
 0x1e8   : > { %1977 = vsyncadd (!%p1621_p13), %s1365_s10, 4294967232  ;;  %p18_p7 = scmp.ge.s32.totalorder %s2053_s21, 4   ;;  %s2407_s15 = smov %s1984_s16 }
 0x1e9   : > { %s2408_s16 = smov %s1988_s17  ;;  %s2409_s17 = smov %s2065_s24 }
 0x1ea   : > { %s2410_s18 = smov %s2053_s21  ;;  %20 = sbr.rel (!%p18_p7) target bundleno = 6 (0x6), region = 88 }
 0x1f1   :  { %1370 = vsyncpa [#allocation3], 1 }
 0x1f2   :  { %1372 = vsyncpa [#allocation3 + $0x1], 1 }
 0x1f3   :  { %1373 = vsyncpa [#allocation6], 1 }
 0x1f4   :  { %1374 = vsyncpa [#allocation4], 1 }
 0x1f5   :  { %1376 = vsyncpa [#allocation4 + $0x1], 1 }

</bundles_post_ra>
